<compile_context>
chip_gen: v6e
topology: v6e:2x2x1
jax: 0.10.0
libtpu: 0.0.40
codegen_flags: <defaults>
</compile_context>

<pallas_src>
import functools

import jax
import jax.numpy as jnp
import numpy as np
from jax.experimental import pallas as pl
from jax.experimental.pallas import tpu as pltpu

LANES = 128
ACC_ROWS = 8            # vreg sublanes: accumulator shape (8, 128)
MAX_TILE_ROWS = 2048    # 1 MiB per f32 input buffer -> safe on v5e/v6e/v7x VMEM


def _dvrl_partial_kernel(est_ref, s_ref, prob_out_ref, sum_out_ref,
                         acc_prob, acc_sum, *, epsilon, binary_selection):
    step = pl.program_id(1)

    @pl.when(step == 0)
    def _init():
        acc_prob[...] = jnp.zeros_like(acc_prob)
        acc_sum[...] = jnp.zeros_like(acc_sum)

    est = est_ref[...]                          # (tile_rows, 128) float32
    s = s_ref[...].astype(jnp.float32)          # widen narrow mask in-kernel

    if binary_selection:
        # s is a {0,1} selection mask: one log per element instead of two
        # (exactly equal to the two-term form for binary s).
        ll = jnp.log(jnp.where(s > 0.5, est + epsilon, 1.0 - est + epsilon))
    else:
        ll = (s * jnp.log(est + epsilon)
              + (1.0 - s) * jnp.log(1.0 - est + epsilon))

    tr = est.shape[0]
    if tr == ACC_ROWS:
        ll_fold, est_fold = ll, est
    else:
        # Fold row groups with vreg-wise VPU adds (no cross-lane XLU reduce,
        # no per-step (1,1) scalar reduction).
        ll_fold = jnp.sum(ll.reshape(tr // ACC_ROWS, ACC_ROWS, LANES), axis=0)
        est_fold = jnp.sum(est.reshape(tr // ACC_ROWS, ACC_ROWS, LANES), axis=0)

    acc_prob[...] += ll_fold
    acc_sum[...] += est_fold

    @pl.when(step == pl.num_programs(1) - 1)
    def _emit():
        prob_out_ref[...] = acc_prob[...]
        sum_out_ref[...] = acc_sum[...]


def dvrl_loss(est_data_value, s_input, reward_input, *,
              epsilon=1e-8, threshold=0.9, binary_selection=True):
    """Pallas implementation of DvrlLoss.forward.

    est_data_value, s_input: shape (N, 1); reward_input: scalar.
    Returns: shape (1,) float32 loss.
    """
    n = int(np.prod(est_data_value.shape))
    assert n % (ACC_ROWS * LANES) == 0, (
        f"demo kernel requires N divisible by {ACC_ROWS * LANES}, got {n}")
    rows = n // LANES

    est2 = jnp.reshape(est_data_value.astype(jnp.float32), (rows, LANES))

    # Keep s in its (possibly narrow) dtype to cut HBM bytes; fall back to f32
    # when the row count is too small for that dtype's native sublane tile.
    s_arr = jnp.asarray(s_input)
    if s_arr.dtype == jnp.bool_:
        s_arr = s_arr.astype(jnp.int8)
    itemsize = jnp.dtype(s_arr.dtype).itemsize
    min_rows = {1: 32, 2: 16}.get(itemsize, 8)
    if rows % min_rows != 0:
        s_arr = s_arr.astype(jnp.float32)
        min_rows = 8
    s2 = jnp.reshape(s_arr, (rows, LANES))

    # Leading parallel axis: 2-way row split (feeds both v7x TensorCores).
    splits = 2 if rows % (2 * min_rows) == 0 else 1
    rows_per_split = rows // splits

    # Largest tile (multiple of min_rows) dividing rows_per_split, <= MAX_TILE_ROWS.
    if rows_per_split <= MAX_TILE_ROWS:
        tile_rows = rows_per_split
    else:
        tile_rows = min_rows
        for cand in range(MAX_TILE_ROWS, min_rows - 1, -min_rows):
            if rows_per_split % cand == 0:
                tile_rows = cand
                break
    inner_steps = rows_per_split // tile_rows

    kernel = functools.partial(
        _dvrl_partial_kernel,
        epsilon=float(epsilon),
        binary_selection=bool(binary_selection),
    )

    row_map = lambda o, i: (o * inner_steps + i, 0)
    acc_map = lambda o, i: (o, 0)

    prob_parts, sum_parts = pl.pallas_call(
        kernel,
        out_shape=(
            jax.ShapeDtypeStruct((splits * ACC_ROWS, LANES), jnp.float32),
            jax.ShapeDtypeStruct((splits * ACC_ROWS, LANES), jnp.float32),
        ),
        grid_spec=pltpu.PrefetchScalarGridSpec(
            num_scalar_prefetch=0,
            grid=(splits, inner_steps),
            in_specs=[
                pl.BlockSpec((tile_rows, LANES), row_map),   # est (f32)
                pl.BlockSpec((tile_rows, LANES), row_map),   # s (narrow dtype ok)
            ],
            out_specs=[
                pl.BlockSpec((ACC_ROWS, LANES), acc_map),    # prob partials
                pl.BlockSpec((ACC_ROWS, LANES), acc_map),    # est-sum partials
            ],
            scratch_shapes=[
                pltpu.VMEM((ACC_ROWS, LANES), jnp.float32),  # acc_prob
                pltpu.VMEM((ACC_ROWS, LANES), jnp.float32),  # acc_sum
            ],
        ),
        compiler_params=pltpu.CompilerParams(
            dimension_semantics=("parallel", "arbitrary")),
    )(est2, s2)

    # O(1) final combine + scalar loss math (reward never touches kernel VMEM).
    prob = jnp.sum(prob_parts)
    mean = jnp.sum(sum_parts) * (1.0 / n)
    reward = jnp.asarray(reward_input, jnp.float32)
    zero = jnp.zeros((1,), jnp.float32)
    loss = (-reward * prob
            + 1000.0 * jnp.maximum(mean - threshold, zero)
            + 1000.0 * jnp.maximum(1.0 - threshold - mean, zero))
    return loss.astype(jnp.float32)


def dvrl_loss_ref(est, s, reward, *, epsilon=1e-8, threshold=0.9):
    one = jnp.ones_like(est)
    prob = jnp.sum(s * jnp.log(est + epsilon)
                   + (one - s) * jnp.log(one - est + epsilon))
    zero = jnp.zeros((1,), jnp.float32)
    return (-reward * prob
            + 1000.0 * jnp.maximum(jnp.mean(est) - threshold, zero)
            + 1000.0 * jnp.maximum(1.0 - threshold - jnp.mean(est), zero))


if __name__ == "__main__":
    key = jax.random.PRNGKey(0)
    k1, k2 = jax.random.split(key)

    N = 8192
    epsilon = 1e-8
    threshold = 0.9

    # est_data_value: probabilities in (0, 1), shape (N, 1)
    est_data_value = jax.random.uniform(k1, (N, 1), jnp.float32,
                                        minval=0.01, maxval=0.99)
    # s_input: binary selection mask, shipped as int8 to cut HBM traffic
    s_input = jax.random.bernoulli(k2, 0.5, (N, 1)).astype(jnp.int8)
    # reward_input: scalar reward
    reward_input = jnp.float32(0.37)

    loss = dvrl_loss(est_data_value, s_input, reward_input,
                     epsilon=epsilon, threshold=threshold)
    loss = jax.block_until_ready(loss)

    ref = dvrl_loss_ref(est_data_value, s_input.astype(jnp.float32),
                        reward_input, epsilon=epsilon, threshold=threshold)
    np.testing.assert_allclose(np.asarray(loss), np.asarray(ref),
                               rtol=1e-5, atol=1e-3)

    print("KERNEL_OK")
</pallas_src>

<mosaic_0001>
module attributes {stable_mosaic.version = 11 : i64} {
  func.func @_dvrl_partial_kernel(%arg0: i32, %arg1: i32, %arg2: memref<32x128xf32, #tpu.memory_space<vmem>>, %arg3: memref<32x128xi8, #tpu.memory_space<vmem>>, %arg4: memref<8x128xf32, #tpu.memory_space<vmem>>, %arg5: memref<8x128xf32, #tpu.memory_space<vmem>>, %arg6: memref<8x128xf32, #tpu.memory_space<vmem>>, %arg7: memref<8x128xf32, #tpu.memory_space<vmem>>) attributes {dimension_semantics = [#tpu.dimension_semantics<parallel>, #tpu.dimension_semantics<arbitrary>], iteration_bounds = array<i64: 2, 1>, scalar_prefetch = 0 : i64, scratch_operands = 2 : i64, tpu.core_type = #tpu.core_type<tc>, window_params = [{transform_indices = @transform_0, window_bounds = array<i64: 32, 128>}, {transform_indices = @transform_1, window_bounds = array<i64: 32, 128>}, {transform_indices = @transform_2, window_bounds = array<i64: 8, 128>}, {transform_indices = @transform_3, window_bounds = array<i64: 8, 128>}]} {
    %c0_i32 = arith.constant 0 : i32
    %0 = arith.cmpi eq, %arg1, %c0_i32 : i32
    %1 = arith.extui %0 : i1 to i32
    %c0_i32_0 = arith.constant 0 : i32
    %2 = arith.cmpi ne, %1, %c0_i32_0 : i32
    scf.if %2 {
      %cst_19 = arith.constant 0.000000e+00 : f32
      %29 = vector.broadcast %cst_19 : f32 to vector<8x128xf32>
      %c0_20 = arith.constant 0 : index
      %c0_21 = arith.constant 0 : index
      %30 = vector.load %arg6[%c0_20, %c0_21] : memref<8x128xf32, #tpu.memory_space<vmem>>, vector<8x128xf32>
      tpu.vector_store %arg6[%c0_20, %c0_21], %29 {strides = array<i32>} : memref<8x128xf32, #tpu.memory_space<vmem>>, vector<8x128xf32>,
      %cst_22 = arith.constant 0.000000e+00 : f32
      %31 = vector.broadcast %cst_22 : f32 to vector<8x128xf32>
      %c0_23 = arith.constant 0 : index
      %c0_24 = arith.constant 0 : index
      %32 = vector.load %arg7[%c0_23, %c0_24] : memref<8x128xf32, #tpu.memory_space<vmem>>, vector<8x128xf32>
      tpu.vector_store %arg7[%c0_23, %c0_24], %31 {strides = array<i32>} : memref<8x128xf32, #tpu.memory_space<vmem>>, vector<8x128xf32>,
    } else {
    }
    %c0 = arith.constant 0 : index
    %c0_1 = arith.constant 0 : index
    %3 = vector.load %arg2[%c0, %c0_1] : memref<32x128xf32, #tpu.memory_space<vmem>>, vector<32x128xf32>
    %c0_2 = arith.constant 0 : index
    %c0_3 = arith.constant 0 : index
    %4 = vector.load %arg3[%c0_2, %c0_3] : memref<32x128xi8, #tpu.memory_space<vmem>>, vector<32x128xi8>
    %5 = arith.sitofp %4 : vector<32x128xi8> to vector<32x128xf32>
    %cst = arith.constant 5.000000e-01 : f32
    %6 = vector.broadcast %cst : f32 to vector<32x128xf32>
    %7 = arith.cmpf ogt, %5, %6 : vector<32x128xf32>
    %cst_4 = arith.constant 9.99999993E-9 : f32
    %8 = vector.broadcast %cst_4 : f32 to vector<32x128xf32>
    %9 = arith.addf %3, %8 : vector<32x128xf32>
    %cst_5 = arith.constant 1.000000e+00 : f32
    %10 = vector.broadcast %cst_5 : f32 to vector<32x128xf32>
    %11 = arith.subf %10, %3 : vector<32x128xf32>
    %cst_6 = arith.constant 9.99999993E-9 : f32
    %12 = vector.broadcast %cst_6 : f32 to vector<32x128xf32>
    %13 = arith.addf %11, %12 : vector<32x128xf32>
    %14 = arith.select %7, %9, %13 : vector<32x128xi1>, vector<32x128xf32>
    %15 = math.log %14 : vector<32x128xf32>
    %16 = vector.shape_cast %15 : vector<32x128xf32> to vector<4x8x128xf32>
    %cst_7 = arith.constant dense<0.000000e+00> : vector<8x128xf32>
    %17 = vector.multi_reduction <add>, %16, %cst_7 [0] : vector<4x8x128xf32> to vector<8x128xf32>
    %18 = vector.shape_cast %3 : vector<32x128xf32> to vector<4x8x128xf32>
    %cst_8 = arith.constant dense<0.000000e+00> : vector<8x128xf32>
    %19 = vector.multi_reduction <add>, %18, %cst_8 [0] : vector<4x8x128xf32> to vector<8x128xf32>
    %c0_9 = arith.constant 0 : index
    %c0_10 = arith.constant 0 : index
    %20 = vector.load %arg6[%c0_9, %c0_10] : memref<8x128xf32, #tpu.memory_space<vmem>>, vector<8x128xf32>
    %21 = arith.addf %20, %17 : vector<8x128xf32>
    %c0_11 = arith.constant 0 : index
    %c0_12 = arith.constant 0 : index
    %22 = vector.load %arg6[%c0_11, %c0_12] : memref<8x128xf32, #tpu.memory_space<vmem>>, vector<8x128xf32>
    tpu.vector_store %arg6[%c0_11, %c0_12], %21 {strides = array<i32>} : memref<8x128xf32, #tpu.memory_space<vmem>>, vector<8x128xf32>,
    %c0_13 = arith.constant 0 : index
    %c0_14 = arith.constant 0 : index
    %23 = vector.load %arg7[%c0_13, %c0_14] : memref<8x128xf32, #tpu.memory_space<vmem>>, vector<8x128xf32>
    %24 = arith.addf %23, %19 : vector<8x128xf32>
    %c0_15 = arith.constant 0 : index
    %c0_16 = arith.constant 0 : index
    %25 = vector.load %arg7[%c0_15, %c0_16] : memref<8x128xf32, #tpu.memory_space<vmem>>, vector<8x128xf32>
    tpu.vector_store %arg7[%c0_15, %c0_16], %24 {strides = array<i32>} : memref<8x128xf32, #tpu.memory_space<vmem>>, vector<8x128xf32>,
    %c0_i32_17 = arith.constant 0 : i32
    %26 = arith.cmpi eq, %arg1, %c0_i32_17 : i32
    %27 = arith.extui %26 : i1 to i32
    %c0_i32_18 = arith.constant 0 : i32
    %28 = arith.cmpi ne, %27, %c0_i32_18 : i32
    scf.if %28 {
      %c0_19 = arith.constant 0 : index
      %c0_20 = arith.constant 0 : index
      %29 = vector.load %arg6[%c0_19, %c0_20] : memref<8x128xf32, #tpu.memory_space<vmem>>, vector<8x128xf32>
      %c0_21 = arith.constant 0 : index
      %c0_22 = arith.constant 0 : index
      %30 = vector.load %arg4[%c0_21, %c0_22] : memref<8x128xf32, #tpu.memory_space<vmem>>, vector<8x128xf32>
      tpu.vector_store %arg4[%c0_21, %c0_22], %29 {strides = array<i32>} : memref<8x128xf32, #tpu.memory_space<vmem>>, vector<8x128xf32>,
      %c0_23 = arith.constant 0 : index
      %c0_24 = arith.constant 0 : index
      %31 = vector.load %arg7[%c0_23, %c0_24] : memref<8x128xf32, #tpu.memory_space<vmem>>, vector<8x128xf32>
      %c0_25 = arith.constant 0 : index
      %c0_26 = arith.constant 0 : index
      %32 = vector.load %arg5[%c0_25, %c0_26] : memref<8x128xf32, #tpu.memory_space<vmem>>, vector<8x128xf32>
      tpu.vector_store %arg5[%c0_25, %c0_26], %31 {strides = array<i32>} : memref<8x128xf32, #tpu.memory_space<vmem>>, vector<8x128xf32>,
    } else {
    }
    return
  }
  func.func @transform_0(%arg0: i32, %arg1: i32) -> (i32, i32) {
    %c1_i32 = arith.constant 1 : i32
    %0 = arith.muli %arg0, %c1_i32 : i32
    %1 = arith.addi %0, %arg1 : i32
    %c0_i32 = arith.constant 0 : i32
    %c0_i32_0 = arith.constant 0 : i32
    return %1, %c0_i32 : i32, i32
  }
  func.func @transform_1(%arg0: i32, %arg1: i32) -> (i32, i32) {
    %c1_i32 = arith.constant 1 : i32
    %0 = arith.muli %arg0, %c1_i32 : i32
    %1 = arith.addi %0, %arg1 : i32
    %c0_i32 = arith.constant 0 : i32
    %c0_i32_0 = arith.constant 0 : i32
    return %1, %c0_i32 : i32, i32
  }
  func.func @transform_2(%arg0: i32, %arg1: i32) -> (i32, i32) {
    %c0_i32 = arith.constant 0 : i32
    %c0_i32_0 = arith.constant 0 : i32
    return %arg0, %c0_i32 : i32, i32
  }
  func.func @transform_3(%arg0: i32, %arg1: i32) -> (i32, i32) {
    %c0_i32 = arith.constant 0 : i32
    %c0_i32_0 = arith.constant 0 : i32
    return %arg0, %c0_i32 : i32, i32
  }
}

</mosaic_0001>

<bundles_post_ra>
// kernel: tpu_custom_call.1
= control target key start
LH: loop header
LB: loop body
LE: loop exit
PB: predicated region body
PF: predicated region fallthrough
CT: control target
= control target key end

     0   :  { %s991_s0 = inlined_call_operand.hbm [shape: f32[64,128], index: 0, kind: input, shape index: {}]   ;;  %s992_s1 = inlined_call_operand.hbm [shape: s8[64,128], index: 1, kind: input, shape index: {}]   ;;  %s993_s2 = inlined_call_operand.hbm [shape: f32[16,128], index: 2, kind: output, shape index: {0}]   ;;  %s994_s3 = inlined_call_operand.hbm [shape: f32[16,128], index: 3, kind: output, shape index: {1}]  }
   0x1   :  { %995 = sst [smem:[#allocation16_spill]] %s991_s0 }
   0x2   :  { %9 = vsyncpa [#allocation5], 0 }
   0x3   :  { %11 = vsyncpa [#allocation5 + $0x1], 0 }
   0x4   :  { %12 = vsyncpa [#allocation8], 0 }
   0x5   :  { %14 = vsyncpa [#allocation8 + $0x1], 0 }
   0x6   :  { %15 = vsyncpa [#allocation6], 0 }
   0x7   :  { %17 = vsyncpa [#allocation6 + $0x1], 0 }
   0x8   :  { %18 = vsyncpa [#allocation11], 0 }
   0x9   :  { %20 = vsyncpa [#allocation11 + $0x1], 0  ;;  %s792_s12 = smov 0   ;;  %s794_s13 = smov 0  }
   0xa   :  { %s796_s14 = smov 0   ;;  %s798_s15 = smov 0  }
   0xb   :  { %s800_s16 = smov 0   ;;  %s802_s17 = smov 0  }
   0xc LB: > { %s491_s18 = sadd.s32 4294967295, %s764_s17   ;;  %s492_s19 = sadd.s32 4294967294, %s764_s17   ;;  %s764_s17 = sphi %s802_s17, %s26_s17   ;;  %s760_s16 = sphi %s800_s16, %s1008_s16   ;;  %s756_s15 = sphi %s798_s15, %s1007_s15   ;;  %s752_s14 = sphi %s796_s14, %s1006_s14   ;;  %s748_s13 = sphi %s794_s13, %s1005_s13   ;;  %s744_s12 = sphi %s792_s12, %s1004_s12  }
   0xd   : > { %s38_s20 = sadd.s32 1, %s760_s16  ;;  %s47_s21 = sadd.s32 1, %s752_s14 }
   0xe   : > { %p40_p0 = scmp.ge.s32.totalorder %s38_s20, 2  ;;  %p54_p1 = scmp.ne.s32.totalorder %s752_s14, %s748_s13 }
   0xf   : > { %p55_p2 = scmp.eq.s32.totalorder %s764_s17, 0  ;;  %p60_p3 = scmp.ne.s32.totalorder %s748_s13, %s744_s12 }
  0x10   : > { %s1010_s20 = smov (%p40_p0, %s38_s20), 0  ;;  %p61_p5 = scmp.eq.s32.totalorder %s491_s18, 0 }
  0x11   : > { %p833_p4 = por %p55_p2, %p54_p1  ;;  %s44_s23 = ssub.s32 %s760_s16, %s1010_s20 }
  0x12   : > { %p112_p6 = scmp.eq.s32.totalorder %s491_s18, 1  ;;  %p45_p7 = scmp.eq.s32.totalorder %s44_s23, 0 }
  0x13   : > { %p839_p8 = por %p61_p5, %p60_p3  ;;  %p118_p10 = scmp.eq.s32.totalorder %s492_s19, 1 }
  0x14   : > { %p843_p9 = por %p112_p6, %p54_p1  ;;  %p534_p13 = scmp.lt.s32.totalorder %s764_s17, 2 }
  0x15   : > { %s848_s26 = scalar_select %p45_p7, %s752_s14, %s47_s21  }
  0x16   : > { %p850_p11 = por %p118_p10, %p60_p3  ;;  %s857_s28 = sand.u32 1, %s752_s14  }
  0x17   : > { %s495_s29 = sshll.u32 %s857_s28, 5  ;;  %s511_s30 = sshll.u32 %s760_s16, 9 }
  0x18   : > { %s1000_s0 = sld [smem:[#allocation16_spill]]  ;;  %s168_s7 = scalar_lea.vmem [#allocation4], %s495_s29 }
  0x19   : > { %s176_s8 = sshll.u32 %s168_s7, 4  ;;  %p866_p0 = pnand %p534_p13, %p833_p4  ;;  %s177_s8 = int_to_ptr.vmem [resolvable:$true] %s176_s8 }
  0x1a   : > { %p500_p1 = scmp.ge.s32.totalorder %s764_s17, 1  ;;  %s165_s10 = scalar_lea.sflag [#allocation5], %s857_s28 }
  0x1b   : > { %p596_p2 = pneg %p866_p0  ;;  %s607_s11 = scalar_lea.vmem %s177_s8, 512 }
  0x1c   : > { %p608_p3 = scmp.ne.s32.totalorder %s177_s8, %s607_s11  ;;  %s766_s18 = smov [#allocation4]  }
  0x1d   : > { %s612_s19 = sshll.u32 %s766_s18, 4  ;;  %s613_s19 = int_to_ptr.vmem [resolvable:$false] %s612_s19 }
  0x1e   : > { %s175_s6 = scalar_lea.hbm %s1000_s0, %s511_s30  ;;  %p610_p5 = pnand %p608_p3, %p596_p2 }
  0x1f   : > { %s614_s21 = scalar_lea.vmem %s613_s19, 1024  ;;  %p615_p4 = scmp.lt.s32.totalorder %s177_s8, %s613_s19 }
  0x20   : > { %p611_p6 = pneg %p610_p5  ;;  %p616_p7 = scmp.lt.s32.totalorder %s614_s21, %s607_s11 }
  0x22   : > { %p617_p10 = por %p616_p7, %p615_p4 }
  0x24   : > { %p618_p13 = pnand %p617_p10, %p611_p6 }
  0x26   : > { %621 = shalt.err (!%p618_p13)
}
  0x27   : > { %s767_s22 = smov 128   ;;  %s768_s23 = smov 8  }
  0x28   : > { %523 = dma.hbm_to_vmem [thread:$0]  (!%p866_p0), %s175_s6, 512, %s177_s8, %s165_s10, %s767_s22, %s767_s22, %s768_s23  }
  0x29   : > { %p203_p3 = scmp.lt.s32.totalorder %s764_s17, 3  ;;  %s498_s29 = sshll.u32 %s857_s28, 3 }
  0x2a   : > { %s499_s30 = sshll.u32 %s760_s16, 7  ;;  %s190_s18 = scalar_lea.vmem [#allocation7], %s498_s29 }
  0x2b   : > { %p884_p5 = pnand %p500_p1, %p203_p3  ;;  %s196_s11 = scalar_lea.hbm %s992_s1, %s499_s30 }
  0x2c   : > { %s198_s19 = sshll.u32 %s190_s18, 4  ;;  %s187_s21 = scalar_lea.sflag [#allocation8], %s857_s28  ;;  %s199_s19 = int_to_ptr.vmem [resolvable:$true] %s198_s19 }
  0x2d   : > { %s635_s0 = scalar_lea.vmem %s199_s19, 128  ;;  %s769_s6 = smov [#allocation7]  }
  0x2e   : > { %p636_p6 = scmp.ne.s32.totalorder %s199_s19, %s635_s0  ;;  %s640_s8 = sshll.u32 %s769_s6, 4  ;;  %s641_s8 = int_to_ptr.vmem [resolvable:$false] %s640_s8 }
  0x2f   : > { %s642_s10 = scalar_lea.vmem %s641_s8, 256  ;;  %p643_p1 = scmp.lt.s32.totalorder %s199_s19, %s641_s8 }
  0x30   : > { %p638_p4 = pnand %p636_p6, %p596_p2  ;;  %p644_p10 = scmp.lt.s32.totalorder %s642_s10, %s635_s0 }
  0x32   : > { %p639_p7 = pneg %p638_p4  ;;  %p645_p13 = por %p644_p10, %p643_p1 }
  0x34   : > { %p646_p3 = pnand %p645_p13, %p639_p7 }
  0x36   : > { %649 = shalt.err (!%p646_p3)
}
  0x37   : > { %526 = dma.hbm_to_vmem [thread:$0]  (!%p866_p0), %s196_s11, 128, %s199_s19, %s187_s21  }
  0x38   : > { %207 = sbr.rel (%p884_p5) target bundleno = 114 (0x72), region = 28  ;;  %s900_s28 = sand.u32 (!%p884_p5), 1, %s748_s13  }
  0x39   : > { %s501_s22 = sshll.u32 (!%p884_p5), %s900_s28, 5  ;;  %s210_s23 = scalar_lea.sflag (!%p884_p5), [#allocation5], %s900_s28 }
  0x3a   : > { %s213_s29 = scalar_lea.vmem (!%p884_p5), [#allocation4], %s501_s22 }
  0x3d   : > { %727 = dma.done.wait (%p839_p8), %s210_s23, 512  }
  0x3e   : > { %729 = vsyncadd (%p839_p8), %s210_s23, 4294966784  ;;  %s909_s0 = sshll.u32 %s900_s28, 3  ;;  %s219_s9 = scalar_lea.sflag [#allocation8], %s900_s28 }
  0x3f   : > { %s222_s30 = scalar_lea.vmem [#allocation7], %s909_s0 }
  0x40   : > { %731 = dma.done.wait (%p839_p8), %s219_s9, 128  }
  0x41   : > { %733 = vsyncadd (%p839_p8), %s219_s9, 4294967168  ;;  %v264_v0 = vld [vmem:[%s213_s29] sm:$0xff]  ;;  %v265_v1 = vld [vmem:[%s213_s29 + $0x8] sm:$0xff]  ;;  %s254_s24 = scalar_lea.vmem [#allocation10], %s909_s0  ;;  %s507_s5 = sshll.u32 %s756_s15, 7 }
  0x42   : > { %v268_v2 = vld [vmem:[%s222_s30] sm:$0xff]  ;;  %v281_v3 = vadd.f32 1e-08, %v264_v0  ;;  %v282_v4 = vadd.f32 1e-08, %v265_v1  ;;  %v308_v5 = vadd.f32 %v265_v1, %v264_v0  ;;  %v266_v6 = vld [vmem:[%s213_s29 + $0x10] sm:$0xff]  ;;  %s354_s18 = scalar_lea.hbm %s994_s3, %s507_s5 }
  0x43   : > { %v267_v7 = vld [vmem:[%s213_s29 + $0x18] sm:$0xff]  ;;  %v269_v8 = vunpack.c.0.s8 %v268_v2  ;;  %v270_v9 = vunpack.c.1.s8 %v268_v2  ;;  %v271_v10 = vunpack.c.2.s8 %v268_v2  ;;  %v272_v11 = vunpack.c.3.s8 %v268_v2  ;;  %s356_s4 = sshll.u32 %s254_s24, 4  ;;  %s330_s19 = scalar_lea.sflag [#allocation11], %s900_s28  ;;  %s919_s4 = int_to_ptr.vmem [resolvable:$true] %s356_s4 }
  0x44   : > { %v283_v12 = vadd.f32 1e-08, %v266_v6  ;;  %v284_v13 = vadd.f32 1e-08, %v267_v7  ;;  %v285_v14 = vsub.f32 1.0, %v264_v0  ;;  %v286_v15 = vsub.f32 1.0, %v265_v1 }
  0x45   : > { %v273_v16 = vcvt.s32.f32 %v269_v8  ;;  %v274_v17 = vcvt.s32.f32 %v270_v9  ;;  %v275_v18 = vcvt.s32.f32 %v271_v10  ;;  %v276_v19 = vcvt.s32.f32 %v272_v11  ;;  %s650_s21 = scalar_lea.vmem %s919_s4, 128  ;;  %s770_s6 = smov [#allocation10]  }
  0x46   : > { %v287_v20 = vsub.f32 1.0, %v266_v6  ;;  %v288_v21 = vsub.f32 1.0, %v267_v7  ;;  %v289_v22 = vadd.f32 1e-08, %v285_v14  ;;  %v290_v23 = vadd.f32 1e-08, %v286_v15  ;;  %p651_p8 = scmp.ne.s32.totalorder %s919_s4, %s650_s21 }
  0x47   : > { %vm277_vm0 = vcmp.gt.f32.partialorder %v273_v16, 0.5  ;;  %vm278_vm1 = vcmp.gt.f32.partialorder %v274_v17, 0.5  ;;  %vm279_vm2 = vcmp.gt.f32.partialorder %v275_v18, 0.5  ;;  %vm280_vm3 = vcmp.gt.f32.partialorder %v276_v19, 0.5  ;;  %s654_s8 = sshll.u32 %s770_s6, 4  ;;  %s655_s8 = int_to_ptr.vmem [resolvable:$false] %s654_s8 }
  0x48   : > { %v291_v24 = vadd.f32 1e-08, %v287_v20  ;;  %v292_v25 = vadd.f32 1e-08, %v288_v21  ;;  %v293_v26 = vsel %vm277_vm0, %v281_v3, %v289_v22  ;;  %v294_v27 = vsel %vm278_vm1, %v282_v4, %v290_v23  ;;  %p652_p0 = pnand %p651_p8, %p843_p9  ;;  %s656_s10 = scalar_lea.vmem %s655_s8, 256 }
  0x49   : > { %586 = vlog2.f32 %v293_v26  ;;  %v309_v28 = vadd.f32 %v308_v5, %v266_v6  ;;  %p657_p5 = scmp.lt.s32.totalorder %s919_s4, %s655_s8  ;;  %p658_p6 = scmp.lt.s32.totalorder %s656_s10, %s650_s21 }
  0x4a   : > { %v295_v29 = vsel %vm279_vm2, %v283_v12, %v291_v24  ;;  %v296_v30 = vsel %vm280_vm3, %v284_v13, %v292_v25  ;;  %588 = vlog2.f32 %v294_v27  ;;  %p653_p2 = pneg %p652_p0 }
  0x4b   : > { %590 = vlog2.f32 %v295_v29  ;;  %v310_v31 = vadd.f32 %v309_v28, %v267_v7  ;;  %p659_p4 = por %p658_p6, %p657_p5 }
  0x4c   : > { %592 = vlog2.f32 %v296_v30 }
  0x4d   : > { %323 = vst [vmem:[%s254_s24] sm:$0xff] %v310_v31  ;;  %p660_p7 = pnand %p659_p4, %p653_p2 }
  0x4f   : > { %663 = shalt.err (!%p660_p7)
}
  0x50   : > { %s664_s22 = scalar_lea.hbm %s354_s18, 128  ;;  %s668_s9 = scalar_lea.hbm %s994_s3, 256 }
  0x51   : > { %p665_p1 = scmp.ne.s32.totalorder %s354_s18, %s664_s22  ;;  %p669_p3 = scmp.lt.s32.totalorder %s354_s18, %s994_s3 }
  0x52   : > { %p670_p8 = scmp.lt.s32.totalorder %s668_s9, %s664_s22 }
  0x53   : > { %p666_p10 = pnand %p665_p1, %p843_p9 }
  0x54   : > { %p671_p0 = por %p670_p8, %p669_p3 }
  0x55   : > { %p667_p13 = pneg %p666_p10 }
  0x57   : > { %p672_p12 = pnand %p671_p0, %p667_p13 }
  0x59   : > { %675 = shalt.err (!%p672_p12)
}
  0x5a   : > { %517 = dma.vmem_to_hbm [thread:$0]  (%p843_p9), %s919_s4, 128, %s354_s18, %s330_s19   ;;  %v587_v32 = vpop.eup %586 }
  0x5b   : > { %v589_v33 = vpop.eup %588  ;;  %v298_v34 = vmul.f32 0.6931472, %v587_v32  ;;  %s247_s7 = scalar_lea.vmem [#allocation9], %s909_s0  ;;  %s341_s19 = scalar_lea.hbm %s993_s2, %s507_s5 }
  0x5c   : > { %v591_v35 = vpop.eup %590  ;;  %v300_v36 = vmul.f32 0.6931472, %v589_v33  ;;  %s343_s11 = sshll.u32 %s247_s7, 4  ;;  %s325_s21 = scalar_lea.sflag [#allocation6], %s900_s28  ;;  %s944_s11 = int_to_ptr.vmem [resolvable:$true] %s343_s11 }
  0x5d   : > { %v593_v37 = vpop.eup %592  ;;  %v302_v38 = vmul.f32 0.6931472, %v591_v35  ;;  %s676_s6 = scalar_lea.vmem %s944_s11, 128  ;;  %s771_s0 = smov [#allocation9]  }
  0x5e   : > { %v304_v39 = vmul.f32 0.6931472, %v593_v37  ;;  %v305_v40 = vadd.f32 %v300_v36, %v298_v34  ;;  %p677_p12 = scmp.ne.s32.totalorder %s944_s11, %s676_s6  ;;  %s680_s8 = sshll.u32 %s771_s0, 4  ;;  %s681_s8 = int_to_ptr.vmem [resolvable:$false] %s680_s8 }
  0x5f   : > { %s682_s10 = scalar_lea.vmem %s681_s8, 256  ;;  %p683_p6 = scmp.lt.s32.totalorder %s944_s11, %s681_s8 }
  0x60   : > { %v306_v41 = vadd.f32 %v305_v40, %v302_v38  ;;  %p678_p2 = pnand %p677_p12, %p843_p9  ;;  %p684_p4 = scmp.lt.s32.totalorder %s682_s10, %s676_s6 }
  0x62   : > { %v307_v42 = vadd.f32 %v306_v41, %v304_v39  ;;  %p679_p5 = pneg %p678_p2  ;;  %p685_p7 = por %p684_p4, %p683_p6 }
  0x64   : > { %321 = vst [vmem:[%s247_s7] sm:$0xff] %v307_v42  ;;  %p686_p1 = pnand %p685_p7, %p679_p5 }
  0x66   : > { %689 = shalt.err (!%p686_p1)
}
  0x67   : > { %s690_s15 = scalar_lea.hbm %s341_s19, 128  ;;  %s694_s22 = scalar_lea.hbm %s993_s2, 256 }
  0x68   : > { %p691_p10 = scmp.ne.s32.totalorder %s341_s19, %s690_s15  ;;  %p695_p8 = scmp.lt.s32.totalorder %s341_s19, %s993_s2 }
  0x69   : > { %p696_p0 = scmp.lt.s32.totalorder %s694_s22, %s690_s15 }
  0x6a   : > { %p692_p13 = pnand %p691_p10, %p843_p9 }
  0x6b   : > { %p697_p12 = por %p696_p0, %p695_p8 }
  0x6c   : > { %p693_p3 = pneg %p692_p13 }
  0x6e   : > { %p698_p2 = pnand %p697_p12, %p693_p3 }
  0x70   : > { %701 = shalt.err (!%p698_p2)
}
  0x71   : > { %516 = dma.vmem_to_hbm [thread:$0]  (%p843_p9), %s944_s11, 128, %s341_s19, %s325_s21  }
  0x72 PF: > { %s368_s9 = sand.u32 1, %s744_s12   ;;  %p1003_p5 = scmp.ge.s32.totalorder %s764_s17, 2 }
  0x73   : > { %s369_s30 = scalar_lea.sflag [#allocation6], %s368_s9 }
  0x74   : > { %p528_p6 = pnand %p1003_p5, %p850_p11 }
  0x76   : > { %p529_p4 = pneg %p528_p6 }
  0x78   : > { %735 = dma.done.wait (%p529_p4), %s369_s30, 128  }
  0x79   : > { %737 = vsyncadd (%p529_p4), %s369_s30, 4294967168  ;;  %s378_s24 = scalar_lea.sflag [#allocation11], %s368_s9 }
  0x7a   : > { %739 = dma.done.wait (%p529_p4), %s378_s24, 128  }
  0x7b   : > { %741 = vsyncadd (%p529_p4), %s378_s24, 4294967168  ;;  %s26_s17 = sadd.s32 1, %s764_s17   ;;  %s1004_s12 = smov %s748_s13 }
  0x7c   : > { %p23_p7 = scmp.ge.s32.totalorder %s26_s17, 4   ;;  %s1005_s13 = smov %s752_s14 }
  0x7d   : > { %s1006_s14 = smov %s848_s26  ;;  %s1007_s15 = smov %s760_s16 }
  0x7e   : > { %s1008_s16 = smov %s1010_s20  ;;  %25 = sbr.rel (!%p23_p7) target bundleno = 12 (0xc), region = 111 }
  0x83   :  { %383 = vsyncpa [#allocation5], 1 }
  0x84   :  { %385 = vsyncpa [#allocation5 + $0x1], 1 }
  0x85   :  { %386 = vsyncpa [#allocation8], 1 }
  0x86   :  { %388 = vsyncpa [#allocation8 + $0x1], 1 }
  0x87   :  { %389 = vsyncpa [#allocation6], 1 }
  0x88   :  { %391 = vsyncpa [#allocation6 + $0x1], 1 }
  0x89   :  { %392 = vsyncpa [#allocation11], 1 }
  0x8a   :  { %394 = vsyncpa [#allocation11 + $0x1], 1 }

</bundles_post_ra>
